<compile_context>
chip_gen: v7x
topology: tpu7x:2x2x1
jax: 0.10.0
libtpu: 0.0.40
codegen_flags: <defaults>
</compile_context>

<pallas_src>
import jax
import jax.numpy as jnp
from jax import lax
from jax.experimental import pallas as pl
from jax.experimental.pallas import tpu as pltpu


def get_disp_kernel(p_ref, w_ref, gb_ref, o_ref):
    """Fused conv3x3(pad=1,stride=1) -> batchnorm(train stats) -> 0.3*sigmoid.

    p_ref  : (N, 9*Cin, H*W)  im2col patches, channels-first, spatial on lanes
    w_ref  : (Cout, 9*Cin)    conv weights, tap-major rows matching p_ref
    gb_ref : (2, Cout, 1)     row 0 = BN gamma, row 1 = BN beta
    o_ref  : (N, Cout, H*W)   output (lane-dense stores)
    """
    n_batch, _, hw = p_ref.shape
    w = w_ref[...]                                                 # (Cout, K)

    # ---- conv: one K=9*Cin contraction matmul per batch element (MXU) ----
    rows = []
    for n in range(n_batch):                                       # N tiny & static
        rows.append(jnp.dot(w, p_ref[n],
                            preferred_element_type=jnp.float32))   # (Cout, HW)

    # ---- BatchNorm2d (training-mode batch stats), folded into one FMA ----
    cnt = jnp.float32(n_batch * hw)
    s1 = sum(jnp.sum(r, axis=1, keepdims=True) for r in rows)      # (Cout, 1)
    s2 = sum(jnp.sum(r * r, axis=1, keepdims=True) for r in rows)  # (Cout, 1)
    mean = s1 / cnt
    var = jnp.maximum(s2 / cnt - mean * mean, 0.0)                 # biased variance
    gamma = gb_ref[0]                                              # (Cout, 1)
    beta = gb_ref[1]                                               # (Cout, 1)
    scale = gamma * lax.rsqrt(var + 1e-5)
    shift = beta - mean * scale

    # ---- normalize + 0.3 * sigmoid, lane-dense stores ----
    for n in range(n_batch):
        y = rows[n] * scale + shift
        o_ref[n] = (0.3 * jax.nn.sigmoid(y)).astype(o_ref.dtype)


def get_disp_forward(x_nchw, weight_oihw, bias, gamma, beta):
    """Matches PyTorch get_disp.forward (training-mode BN). x_nchw: (N, Cin, H, W).

    `bias` is accepted for parameter parity but unused: a conv bias immediately
    followed by training-mode BatchNorm is exactly cancelled by the batch-mean
    subtraction, so the forward output is identical without it.
    """
    del bias
    N, Cin, H, W = x_nchw.shape
    Cout = weight_oihw.shape[0]
    HW = H * W
    K = 9 * Cin

    x = x_nchw.astype(jnp.float32)
    xp = jnp.pad(x, ((0, 0), (0, 0), (1, 1), (1, 1)))              # F.pad(x, (1,1,1,1))

    # im2col, channels-first, spatial flattened last (tap-major row order)
    taps = []
    for ky in range(3):
        for kx in range(3):
            taps.append(xp[:, :, ky:ky + H, kx:kx + W].reshape(N, Cin, HW))
    patches = jnp.concatenate(taps, axis=1)                        # (N, 9*Cin, HW)

    # (Cout, Cin, 3, 3) -> (Cout, ky, kx, Cin) -> (Cout, 9*Cin): same tap order
    w2 = jnp.transpose(weight_oihw.astype(jnp.float32), (0, 2, 3, 1)).reshape(Cout, K)

    gb = jnp.stack([gamma, beta]).astype(jnp.float32).reshape(2, Cout, 1)

    # TODO(synk): for non-toy shapes, tile the grid over N/H (halo rows), split BN
    # into a stats pass + normalize pass so batch statistics stay global, set
    # pltpu.CompilerParams(vmem_limit_bytes=...) (v7x has only 64 MiB VMEM), and
    # mark the tiled axis "parallel" to use the second v7x TensorCore.
    out_flat = pl.pallas_call(
        get_disp_kernel,
        out_shape=jax.ShapeDtypeStruct((N, Cout, HW), jnp.float32),
        grid=(1,),
        in_specs=[
            pl.BlockSpec((N, K, HW), lambda i: (0, 0, 0)),
            pl.BlockSpec((Cout, K), lambda i: (0, 0)),
            pl.BlockSpec((2, Cout, 1), lambda i: (0, 0, 0)),
        ],
        out_specs=pl.BlockSpec((N, Cout, HW), lambda i: (0, 0, 0)),
        compiler_params=pltpu.CompilerParams(
            dimension_semantics=("arbitrary",)),
    )(patches, w2, gb)

    return out_flat.reshape(N, Cout, H, W)                         # free contiguous reshape


def _reference(x, w, b, g, bt):
    """Pure-JAX reference of the PyTorch module (training-mode BN)."""
    xp = jnp.pad(x, ((0, 0), (0, 0), (1, 1), (1, 1)))
    conv = lax.conv_general_dilated(
        xp, w, window_strides=(1, 1), padding="VALID",
        dimension_numbers=("NCHW", "OIHW", "NCHW"))
    conv = conv + b.reshape(1, -1, 1, 1)
    mean = jnp.mean(conv, axis=(0, 2, 3), keepdims=True)
    var = jnp.mean((conv - mean) ** 2, axis=(0, 2, 3), keepdims=True)
    y = (conv - mean) * lax.rsqrt(var + 1e-5)
    y = y * g.reshape(1, -1, 1, 1) + bt.reshape(1, -1, 1, 1)
    return 0.3 * jax.nn.sigmoid(y)


if __name__ == "__main__":
    # shapes consistent with the module: num_in_layers=4, batch=2, 16x16 spatial
    N, Cin, H, W = 2, 4, 16, 16
    Cout = 2

    key = jax.random.PRNGKey(0)
    kx, kw, kb = jax.random.split(key, 3)

    x = jax.random.normal(kx, (N, Cin, H, W), dtype=jnp.float32)

    # deterministic parameter init (shapes from nn.Conv2d(Cin, 2, 3) / BN(2))
    fan_in = Cin * 3 * 3
    bound = 1.0 / float(fan_in) ** 0.5
    weight = jax.random.uniform(kw, (Cout, Cin, 3, 3), jnp.float32, -bound, bound)
    bias = jax.random.uniform(kb, (Cout,), jnp.float32, -bound, bound)
    gamma = jnp.ones((Cout,), jnp.float32)       # BN default affine init
    beta = jnp.zeros((Cout,), jnp.float32)

    out = get_disp_forward(x, weight, bias, gamma, beta)
    out = jax.block_until_ready(out)
    assert out.shape == (N, Cout, H, W)

    ref = jax.block_until_ready(_reference(x, weight, bias, gamma, beta))
    max_err = float(jnp.max(jnp.abs(out - ref)))
    assert max_err < 1e-4, f"mismatch vs reference: {max_err}"

    print("KERNEL_OK")
</pallas_src>

<mosaic_0001>
module attributes {stable_mosaic.version = 11 : i64} {
  func.func @get_disp_kernel(%arg0: i32, %arg1: memref<2x36x256xf32, #tpu.memory_space<vmem>>, %arg2: memref<2x36xf32, #tpu.memory_space<vmem>>, %arg3: memref<2x2x1xf32, #tpu.memory_space<vmem>>, %arg4: memref<2x2x256xf32, #tpu.memory_space<vmem>>) attributes {dimension_semantics = [#tpu.dimension_semantics<arbitrary>], iteration_bounds = array<i64: 1>, scalar_prefetch = 0 : i64, scratch_operands = 0 : i64, tpu.core_type = #tpu.core_type<tc>, window_params = [{pipeline_mode = #tpu.pipeline_mode<synchronous>, transform_indices = @transform_0, window_bounds = array<i64: 2, 36, 256>}, {pipeline_mode = #tpu.pipeline_mode<synchronous>, transform_indices = @transform_1, window_bounds = array<i64: 2, 36>}, {pipeline_mode = #tpu.pipeline_mode<synchronous>, transform_indices = @transform_2, window_bounds = array<i64: 2, 2, 1>}, {pipeline_mode = #tpu.pipeline_mode<synchronous>, transform_indices = @transform_3, window_bounds = array<i64: 2, 2, 256>}]} {
    %c0 = arith.constant 0 : index
    %c0_0 = arith.constant 0 : index
    %0 = vector.load %arg2[%c0, %c0_0] : memref<2x36xf32, #tpu.memory_space<vmem>>, vector<2x36xf32>
    %c0_1 = arith.constant 0 : index
    %c0_2 = arith.constant 0 : index
    %c0_3 = arith.constant 0 : index
    %1 = vector.load %arg1[%c0_1, %c0_2, %c0_3] : memref<2x36x256xf32, #tpu.memory_space<vmem>>, vector<1x36x256xf32>
    %2 = vector.shape_cast %1 : vector<1x36x256xf32> to vector<36x256xf32>
    %cst = arith.constant dense<0.000000e+00> : vector<2x256xf32>
    %3 = tpu.matmul %0, %2, %cst {dimension_numbers = #tpu.dot_dimension_numbers<[1], [0], [0], [1], [0, 0, 1, 1], [], []>} : vector<2x36xf32>, vector<36x256xf32>, vector<2x256xf32> -> vector<2x256xf32>
    %c1 = arith.constant 1 : index
    %c0_4 = arith.constant 0 : index
    %c0_5 = arith.constant 0 : index
    %4 = vector.load %arg1[%c1, %c0_4, %c0_5] : memref<2x36x256xf32, #tpu.memory_space<vmem>>, vector<1x36x256xf32>
    %5 = vector.shape_cast %4 : vector<1x36x256xf32> to vector<36x256xf32>
    %cst_6 = arith.constant dense<0.000000e+00> : vector<2x256xf32>
    %6 = tpu.matmul %0, %5, %cst_6 {dimension_numbers = #tpu.dot_dimension_numbers<[1], [0], [0], [1], [0, 0, 1, 1], [], []>} : vector<2x36xf32>, vector<36x256xf32>, vector<2x256xf32> -> vector<2x256xf32>
    %cst_7 = arith.constant dense<0.000000e+00> : vector<2xf32>
    %7 = vector.multi_reduction <add>, %3, %cst_7 [1] : vector<2x256xf32> to vector<2xf32>
    %8 = vector.shape_cast %7 : vector<2xf32> to vector<2x1xf32>
    %cst_8 = arith.constant 0.000000e+00 : f32
    %9 = vector.broadcast %cst_8 : f32 to vector<2x1xf32>
    %10 = arith.addf %9, %8 : vector<2x1xf32>
    %cst_9 = arith.constant dense<0.000000e+00> : vector<2xf32>
    %11 = vector.multi_reduction <add>, %6, %cst_9 [1] : vector<2x256xf32> to vector<2xf32>
    %12 = vector.shape_cast %11 : vector<2xf32> to vector<2x1xf32>
    %13 = arith.addf %10, %12 : vector<2x1xf32>
    %14 = arith.mulf %3, %3 : vector<2x256xf32>
    %cst_10 = arith.constant dense<0.000000e+00> : vector<2xf32>
    %15 = vector.multi_reduction <add>, %14, %cst_10 [1] : vector<2x256xf32> to vector<2xf32>
    %16 = vector.shape_cast %15 : vector<2xf32> to vector<2x1xf32>
    %cst_11 = arith.constant 0.000000e+00 : f32
    %17 = vector.broadcast %cst_11 : f32 to vector<2x1xf32>
    %18 = arith.addf %17, %16 : vector<2x1xf32>
    %19 = arith.mulf %6, %6 : vector<2x256xf32>
    %cst_12 = arith.constant dense<0.000000e+00> : vector<2xf32>
    %20 = vector.multi_reduction <add>, %19, %cst_12 [1] : vector<2x256xf32> to vector<2xf32>
    %21 = vector.shape_cast %20 : vector<2xf32> to vector<2x1xf32>
    %22 = arith.addf %18, %21 : vector<2x1xf32>
    %cst_13 = arith.constant 5.120000e+02 : f32
    %23 = vector.broadcast %cst_13 : f32 to vector<2x1xf32>
    %24 = arith.divf %13, %23 : vector<2x1xf32>
    %cst_14 = arith.constant 5.120000e+02 : f32
    %25 = vector.broadcast %cst_14 : f32 to vector<2x1xf32>
    %26 = arith.divf %22, %25 : vector<2x1xf32>
    %27 = arith.mulf %24, %24 : vector<2x1xf32>
    %28 = arith.subf %26, %27 : vector<2x1xf32>
    %cst_15 = arith.constant 0.000000e+00 : f32
    %29 = vector.broadcast %cst_15 : f32 to vector<2x1xf32>
    %30 = arith.maximumf %28, %29 : vector<2x1xf32>
    %c0_16 = arith.constant 0 : index
    %c0_17 = arith.constant 0 : index
    %c0_18 = arith.constant 0 : index
    %31 = vector.load %arg3[%c0_16, %c0_17, %c0_18] : memref<2x2x1xf32, #tpu.memory_space<vmem>>, vector<1x2x1xf32>
    %32 = vector.shape_cast %31 : vector<1x2x1xf32> to vector<2x1xf32>
    %c1_19 = arith.constant 1 : index
    %c0_20 = arith.constant 0 : index
    %c0_21 = arith.constant 0 : index
    %33 = vector.load %arg3[%c1_19, %c0_20, %c0_21] : memref<2x2x1xf32, #tpu.memory_space<vmem>>, vector<1x2x1xf32>
    %34 = vector.shape_cast %33 : vector<1x2x1xf32> to vector<2x1xf32>
    %cst_22 = arith.constant 9.99999974E-6 : f32
    %35 = vector.broadcast %cst_22 : f32 to vector<2x1xf32>
    %36 = arith.addf %30, %35 : vector<2x1xf32>
    %37 = math.rsqrt %36 : vector<2x1xf32>
    %38 = arith.mulf %32, %37 : vector<2x1xf32>
    %39 = arith.mulf %24, %38 : vector<2x1xf32>
    %40 = arith.subf %34, %39 : vector<2x1xf32>
    %41 = vector.broadcast %38 : vector<2x1xf32> to vector<2x256xf32>
    %42 = arith.mulf %3, %41 : vector<2x256xf32>
    %43 = vector.broadcast %40 : vector<2x1xf32> to vector<2x256xf32>
    %44 = arith.addf %42, %43 : vector<2x256xf32>
    %45 = arith.negf %44 : vector<2x256xf32>
    %46 = math.exp %45 : vector<2x256xf32>
    %cst_23 = arith.constant 1.000000e+00 : f32
    %47 = vector.broadcast %cst_23 : f32 to vector<2x256xf32>
    %48 = arith.addf %47, %46 : vector<2x256xf32>
    %49 = arith.divf %47, %48 : vector<2x256xf32>
    %cst_24 = arith.constant 3.000000e-01 : f32
    %50 = vector.broadcast %cst_24 : f32 to vector<2x256xf32>
    %51 = arith.mulf %50, %49 : vector<2x256xf32>
    %c0_25 = arith.constant 0 : index
    %c0_26 = arith.constant 0 : index
    %c0_27 = arith.constant 0 : index
    %52 = vector.load %arg4[%c0_25, %c0_26, %c0_27] : memref<2x2x256xf32, #tpu.memory_space<vmem>>, vector<1x2x256xf32>
    %53 = vector.shape_cast %52 : vector<1x2x256xf32> to vector<2x256xf32>
    %54 = vector.shape_cast %51 : vector<2x256xf32> to vector<1x2x256xf32>
    tpu.vector_store %arg4[%c0_25, %c0_26, %c0_27], %54 {strides = array<i32>} : memref<2x2x256xf32, #tpu.memory_space<vmem>>, vector<1x2x256xf32>,
    %55 = vector.broadcast %38 : vector<2x1xf32> to vector<2x256xf32>
    %56 = arith.mulf %6, %55 : vector<2x256xf32>
    %57 = vector.broadcast %40 : vector<2x1xf32> to vector<2x256xf32>
    %58 = arith.addf %56, %57 : vector<2x256xf32>
    %59 = arith.negf %58 : vector<2x256xf32>
    %60 = math.exp %59 : vector<2x256xf32>
    %cst_28 = arith.constant 1.000000e+00 : f32
    %61 = vector.broadcast %cst_28 : f32 to vector<2x256xf32>
    %62 = arith.addf %61, %60 : vector<2x256xf32>
    %63 = arith.divf %61, %62 : vector<2x256xf32>
    %cst_29 = arith.constant 3.000000e-01 : f32
    %64 = vector.broadcast %cst_29 : f32 to vector<2x256xf32>
    %65 = arith.mulf %64, %63 : vector<2x256xf32>
    %c1_30 = arith.constant 1 : index
    %c0_31 = arith.constant 0 : index
    %c0_32 = arith.constant 0 : index
    %66 = vector.load %arg4[%c1_30, %c0_31, %c0_32] : memref<2x2x256xf32, #tpu.memory_space<vmem>>, vector<1x2x256xf32>
    %67 = vector.shape_cast %66 : vector<1x2x256xf32> to vector<2x256xf32>
    %68 = vector.shape_cast %65 : vector<2x256xf32> to vector<1x2x256xf32>
    tpu.vector_store %arg4[%c1_30, %c0_31, %c0_32], %68 {strides = array<i32>} : memref<2x2x256xf32, #tpu.memory_space<vmem>>, vector<1x2x256xf32>,
    return
  }
  func.func @transform_0(%arg0: i32) -> (i32, i32, i32) {
    %c0_i32 = arith.constant 0 : i32
    %c0_i32_0 = arith.constant 0 : i32
    %c0_i32_1 = arith.constant 0 : i32
    %c0_i32_2 = arith.constant 0 : i32
    return %c0_i32, %c0_i32_0, %c0_i32_1 : i32, i32, i32
  }
  func.func @transform_1(%arg0: i32) -> (i32, i32) {
    %c0_i32 = arith.constant 0 : i32
    %c0_i32_0 = arith.constant 0 : i32
    %c0_i32_1 = arith.constant 0 : i32
    return %c0_i32, %c0_i32_0 : i32, i32
  }
  func.func @transform_2(%arg0: i32) -> (i32, i32, i32) {
    %c0_i32 = arith.constant 0 : i32
    %c0_i32_0 = arith.constant 0 : i32
    %c0_i32_1 = arith.constant 0 : i32
    %c0_i32_2 = arith.constant 0 : i32
    return %c0_i32, %c0_i32_0, %c0_i32_1 : i32, i32, i32
  }
  func.func @transform_3(%arg0: i32) -> (i32, i32, i32) {
    %c0_i32 = arith.constant 0 : i32
    %c0_i32_0 = arith.constant 0 : i32
    %c0_i32_1 = arith.constant 0 : i32
    %c0_i32_2 = arith.constant 0 : i32
    return %c0_i32, %c0_i32_0, %c0_i32_1 : i32, i32, i32
  }
}

</mosaic_0001>

<bundles_post_ra>
// kernel: tpu_custom_call.1
= control target key start
LH: loop header
LB: loop body
LE: loop exit
PB: predicated region body
PF: predicated region fallthrough
CT: control target
= control target key end

     0   :  { %v414_v7 = vmov 0.0   ;;  %vm30_vm0 = vcmask 1043456   ;;  %s528_s0 = inlined_call_operand.vmem [shape: f32[2,36,256], index: 0, kind: input, shape index: {}]   ;;  %s529_s1 = inlined_call_operand.vmem [shape: f32[2,36], index: 1, kind: input, shape index: {}]   ;;  %s530_s2 = inlined_call_operand.vmem [shape: f32[2,2,1], index: 2, kind: input, shape index: {}]   ;;  %s531_s3 = inlined_call_operand.hbm [shape: f32[2,2,256], index: 3, kind: output, shape index: {}]  }
   0x1   :  { %v17_v0 = vld [vmem:[%s528_s0 + $0x8] sm:$0xff]  ;;  %v19_v1 = vld [vmem:[%s528_s0 + $0x18] sm:$0xff]  ;;  %v16_v2 = vld [vmem:[%s528_s0] sm:$0xff]  ;;  %101 = vmatprep.mubr.f32.mxu0 %v414_v7  ;;  %189 = vmatprep.mubr.f32.mxu1 %v414_v7 }
   0x2   :  { %v349_v3 = vpack.c.bf16 %v19_v1, %v17_v0  ;;  %v18_v4 = vld [vmem:[%s528_s0 + $0x10] sm:$0xff]  ;;  %v330_v5 = vld [vmem:[%s528_s0 + $0x58] sm:$0xff]  ;;  %v332_v6 = vld [vmem:[%s528_s0 + $0x68] sm:$0xff] }
   0x3   :  { %v351_v8 = vpack.c.bf16 %v18_v4, %v16_v2  ;;  %v357_v9 = vpack.c.bf16 %v332_v6, %v330_v5  ;;  %v21_v10 = vld [vmem:[%s528_s0 + $0x28] sm:$0xff]  ;;  %v23_v11 = vld [vmem:[%s528_s0 + $0x38] sm:$0xff]  ;;  %v329_v12 = vld [vmem:[%s528_s0 + $0x50] sm:$0xff] }
   0x4   :  { %350 = vmatprep.subr.bf16.mxu0 %v349_v3  ;;  %v353_v13 = vpack.c.bf16 %v23_v11, %v21_v10  ;;  %v331_v14 = vld [vmem:[%s528_s0 + $0x60] sm:$0xff]  ;;  %v22_v16 = vld [vmem:[%s528_s0 + $0x30] sm:$0xff]  ;;  %v334_v19 = vld [vmem:[%s528_s0 + $0x78] sm:$0xff] }
   0x5   :  { %v20_v15 = vld [vmem:[%s528_s0 + $0x20] sm:$0xff]  ;;  %352 = vmatpush1.bf16.msra.mxu0 %v351_v8  ;;  %358 = vmatprep.subr.bf16.mxu1 %v357_v9  ;;  %v359_v17 = vpack.c.bf16 %v331_v14, %v329_v12  ;;  %v336_v20 = vld [vmem:[%s528_s0 + $0x88] sm:$0xff]  ;;  %v333_v22 = vld [vmem:[%s528_s0 + $0x70] sm:$0xff] }
   0x6   :  { %v355_v18 = vpack.c.bf16 %v22_v16, %v20_v15  ;;  %354 = vmatprep.subr.bf16.mxu0 %v353_v13  ;;  %v361_v21 = vpack.c.bf16 %v336_v20, %v334_v19  ;;  %v335_v23 = vld [vmem:[%s528_s0 + $0x80] sm:$0xff]  ;;  %v25_v24 = vld [vmem:[%s528_s0 + $0x48] sm:$0xf] }
   0x7   :  { %360 = vmatpush1.bf16.msra.mxu1 %v359_v17  ;;  %v363_v25 = vpack.c.bf16 %v335_v23, %v333_v22 }
   0x8   :  { %362 = vmatprep.subr.bf16.mxu1 %v361_v21 }
   0x9   :  { %8 = vsyncpa [#allocation3], 0  ;;  %356 = vmatpush1.bf16.msra.mxu0 %v355_v18  ;;  %v338_v26 = vld [vmem:[%s528_s0 + $0x98] sm:$0xf]  ;;  %v24_v27 = vld [vmem:[%s528_s0 + $0x40] sm:$0xf] }
   0xa   :  { %326 = vmatprep.subr.msk.mxu0 %vm30_vm0, %v25_v24  ;;  %v15_v28 = vld [vmem:[%s529_s1] sm:$0x3]  ;;  %vm26_vm1 = vcmask 293888   ;;  %v337_v29 = vld [vmem:[%s528_s0 + $0x90] sm:$0xf]  ;;  %vm196_vm2 = vcmask 1041408  }
   0xb   :  { %364 = vmatpush1.bf16.msra.mxu1 %v363_v25  ;;  %v415_v50 = vmov 0   ;;  %v231_v63 = vld [vmem:[%s530_s2] sm:$0x3]  ;;  %v342_v2 = vld [vmem:[%s530_s2 + $0x2] sm:$0x3]  ;;  %s416_s2 = smov [#allocation2]  }
   0xc   :  { %339 = vmatprep.subr.msk.mxu1 %vm30_vm0, %v338_v26  ;;  %370 = vset.pattern.permute.xlu0 %v415_v50  ;;  %s315_s29 = sshll.u32 %s416_s2, 4  ;;  %s316_s29 = int_to_ptr.vmem [resolvable:$true] %s315_s29 }
   0xd   :  { %327 = vmatpush1.msk.msra.mxu0 %vm30_vm0, %v24_v27  ;;  %371 = vset.pattern.permute.xlu1 %v415_v50  ;;  %s390_s30 = scalar_lea.vmem %s316_s29, 128  ;;  %p395_p1 = scmp.lt.s32.totalorder %s316_s29, %s316_s29 }
   0xe   :  { %328 = vmatmul.mubr.msk.f32.vlgmr.msra.gmra.mrb[0].mxu0 %vm26_vm1, %v15_v28  ;;  %p391_p0 = scmp.ne.s32.totalorder %s316_s29, %s390_s30  ;;  %p396_p2 = scmp.lt.s32.totalorder %s390_s30, %s390_s30 }
   0xf   :  { %340 = vmatpush1.msk.msra.mxu1 %vm30_vm0, %v337_v29 }
  0x10   :  { %341 = vmatmul.mubr.msk.f32.vlgmr.msra.gmra.mrb[0].mxu1 %vm26_vm1, %v15_v28  ;;  %p397_p3 = por %p396_p2, %p395_p1 }
  0x12   :  { %p398_p4 = pnand %p397_p3, %p391_p0 }
  0xe1   :  { %v103_v30 = vpop.f32.mrb[0].mxu0 }
  0xe2   :  { %v105_v31 = vpop.f32.mrb[1].mxu0  ;;  %v197_v32 = vsel %vm196_vm2, %v103_v30, 0.0  ;;  %v209_v33 = vmul.f32 %v103_v30, %v103_v30 }
  0xe3   :  { %v210_v34 = vmul.f32 %v105_v31, %v105_v31  ;;  %v191_v35 = vpop.f32.mrb[0].mxu1  ;;  %v198_v36 = vsel %vm196_vm2, %v105_v31, 0.0 }
  0xe4   :  { %v217_v37 = vmul.f32 %v191_v35, %v191_v35  ;;  %v193_v38 = vpop.f32.mrb[1].mxu1  ;;  %v199_v39 = vadd.f32 %v198_v36, %v197_v32  ;;  %v211_v40 = vsel %vm196_vm2, %v209_v33, 0.0  ;;  %v203_v41 = vsel %vm196_vm2, %v191_v35, 0.0 }
  0xe5   :  { %v204_v42 = vsel %vm196_vm2, %v193_v38, 0.0  ;;  %v218_v43 = vmul.f32 %v193_v38, %v193_v38  ;;  %v212_v44 = vsel %vm196_vm2, %v210_v34, 0.0 }
  0xe6   :  { %200 = vadd.xlane.f32.xlu0 %v199_v39  ;;  %v213_v45 = vadd.f32 %v212_v44, %v211_v40  ;;  %v205_v46 = vadd.f32 %v204_v42, %v203_v41  ;;  %v219_v47 = vsel %vm196_vm2, %v217_v37, 0.0 }
  0xe7   :  { %v220_v48 = vsel %vm196_vm2, %v218_v43, 0.0 }
  0xe8   :  { %214 = vadd.xlane.f32.xlu1 %v213_v45  ;;  %v221_v49 = vadd.f32 %v220_v48, %v219_v47 }
  0xea   :  { %206 = vadd.xlane.f32.xlu0 %v205_v46 }
  0xec   :  { %222 = vadd.xlane.f32.xlu1 %v221_v49 }
 0x173   :  { %v201_v51 = vpop.xlane.xlu0 %200 }
 0x175   :  { %v215_v52 = vpop.xlane.xlu1 %214 }
 0x177   :  { %v207_v53 = vpop.xlane.xlu0 %206 }
 0x178   :  { %v208_v54 = vadd.f32 %v207_v53, %v201_v51 }
 0x179   :  { %v223_v55 = vpop.xlane.xlu1 %222 }
 0x17a   :  { %v226_v56 = vmul.f32 0.001953125, %v208_v54  ;;  %v224_v57 = vadd.f32 %v223_v55, %v215_v52 }
 0x17c   :  { %v228_v58 = vmul.f32 %v226_v56, %v226_v56  ;;  %v227_v59 = vmul.f32 0.001953125, %v224_v57 }
 0x17e   :  { %v229_v60 = vsub.f32 %v227_v59, %v228_v58 }
 0x180   :  { %v230_v61 = vmax.f32 %v229_v60, 0.0 }
 0x182   :  { %v234_v62 = vadd.f32 1e-05, %v230_v61 }
 0x184   :  { %372 = vrsqrt.f32 %v234_v62 }
 0x18e   :  { %v373_v0 = vpop.eup %372 }
 0x18f   :  { %v236_v1 = vmul.f32 %v373_v0, %v231_v63 }
 0x191   :  { %241 = vperm.xlu0 %370, %v236_v1   ;;  %v237_v3 = vmul.f32 %v236_v1, %v226_v56 }
 0x193   :  { %v238_v4 = vsub.f32 %v342_v2, %v237_v3 }
 0x195   :  { %248 = vperm.xlu1 %371, %v238_v4  }
 0x210   :  { %v242_v5 = vpop.permute.xlu0 %241 }
 0x211   :  { %v244_v6 = vmul.f32 %v242_v5, %v103_v30  ;;  %v245_v7 = vmul.f32 %v242_v5, %v105_v31  ;;  %v279_v8 = vmul.f32 %v242_v5, %v191_v35  ;;  %v280_v9 = vmul.f32 %v242_v5, %v193_v38 }
 0x214   :  { %v249_v10 = vpop.permute.xlu1 %248 }
 0x215   :  { %v251_v11 = vadd.f32 %v249_v10, %v244_v6  ;;  %v252_v12 = vadd.f32 %v249_v10, %v245_v7  ;;  %v281_v13 = vadd.f32 %v279_v8, %v249_v10  ;;  %v282_v14 = vadd.f32 %v280_v9, %v249_v10 }
 0x217   :  { %v343_v15 = vmul.f32 -1.442695, %v251_v11  ;;  %v344_v16 = vmul.f32 -1.442695, %v252_v12  ;;  %v346_v17 = vmul.f32 -1.442695, %v281_v13 }
 0x218   :  { %v347_v18 = vmul.f32 -1.442695, %v282_v14 }
 0x219   :  { %374 = vpow2.f32 %v343_v15 }
 0x21a   :  { %376 = vpow2.f32 %v344_v16 }
 0x21b   :  { %378 = vpow2.f32 %v346_v17 }
 0x21c   :  { %380 = vpow2.f32 %v347_v18 }
 0x223   :  { %v375_v19 = vpop.eup %374 }
 0x224   :  { %v377_v20 = vpop.eup %376  ;;  %v259_v21 = vadd.f32 1.0, %v375_v19 }
 0x225   :  { %v379_v22 = vpop.eup %378  ;;  %v260_v23 = vadd.f32 1.0, %v377_v20 }
 0x226   :  { %v381_v24 = vpop.eup %380  ;;  %382 = vrcp.f32 %v259_v21  ;;  %v289_v25 = vadd.f32 1.0, %v379_v22 }
 0x227   :  { %384 = vrcp.f32 %v260_v23  ;;  %v290_v26 = vadd.f32 1.0, %v381_v24 }
 0x228   :  { %386 = vrcp.f32 %v289_v25 }
 0x229   :  { %388 = vrcp.f32 %v290_v26 }
 0x230   :  { %v383_v27 = vpop.eup %382 }
 0x231   :  { %v385_v28 = vpop.eup %384  ;;  %v265_v29 = vmul.f32 0.3, %v383_v27 }
 0x232   :  { %v387_v30 = vpop.eup %386  ;;  %v266_v31 = vmul.f32 0.3, %v385_v28 }
 0x233   :  { %v389_v32 = vpop.eup %388  ;;  %v295_v33 = vmul.f32 0.3, %v387_v30 }
 0x234   :  { %v296_v34 = vmul.f32 0.3, %v389_v32  ;;  %v269_v35 = vcombine.low %v265_v29, %v266_v31 }
 0x236   :  { %345 = vst.sshfl [vmem:[#allocation2] sm:$0x33 pattern:$0x76325410] %v269_v35  ;;  %v299_v36 = vcombine.low %v295_v33, %v296_v34 }
 0x238   :  { %348 = vst.sshfl [vmem:[#allocation2 + $0x4] sm:$0x33 pattern:$0x76325410] %v299_v36 }
 0x239   :  { %401 = shalt.err (!%p398_p4)
}
 0x23a   :  { %s402_s6 = scalar_lea.hbm %s531_s3, 128 }
 0x23b   :  { %p403_p5 = scmp.ne.s32.totalorder %s531_s3, %s402_s6  ;;  %p406_p6 = scmp.lt.u32.totalorder %s402_s6, %s531_s3 }
 0x23d   :  { %p408_p7 = pnand %p406_p6, %p403_p5 }
 0x23f   :  { %411 = shalt.err (!%p408_p7)
}
 0x240   :  { %s417_s11 = smov 64   ;;  %s418_s12 = smov 4  }
 0x241   :  { %321 = dma.vmem_to_hbm [thread:$0]  %s316_s29, 128, %s531_s3, [#allocation3], %s417_s11, %s417_s11, %s418_s12  }
 0x242   :  { %412 = dma.done.wait [#allocation3], 128  }
 0x243   :  { %413 = vsyncadd [#allocation3], 4294967168 }
 0x244   :  { %325 = vsyncpa [#allocation3], 1 }

</bundles_post_ra>
